<compile_context>
chip_gen: v6e
topology: v6e:2x2x1
jax: 0.10.0
libtpu: 0.0.40
codegen_flags: <defaults>
</compile_context>

<pallas_src>
import jax
import jax.numpy as jnp
from jax import lax
from jax.experimental import pallas as pl
from jax.experimental.pallas import tpu as pltpu


def _round_up(x, m):
    return ((x + m - 1) // m) * m


def ffn_kernel(x_ref, w1_ref, b1_ref, w2_ref, b2_ref, o_ref, acc_ref):
    # x_ref:  (TM, D)   row tile of flattened input
    # w1_ref: (TF, D)   F-tile of W1, PyTorch (out, in) layout
    # b1_ref: (1, TF)
    # w2_ref: (D, TF)   F-tile of W2, PyTorch (out, in) layout
    # b2_ref: (1, D)
    # o_ref:  (TM, D)
    # acc_ref:(TM, D)   f32 accumulator, persistent across the F grid axis
    f = pl.program_id(1)

    @pl.when(f == 0)
    def _():
        acc_ref[...] = jnp.zeros_like(acc_ref)

    # First matmul: contract D.  x (TM, D) . W1_tile (TF, D) -> (TM, TF)
    h = lax.dot_general(
        x_ref[...], w1_ref[...],
        dimension_numbers=(((1,), (1,)), ((), ())),
        preferred_element_type=jnp.float32,
    )
    h = jnp.maximum(h + b1_ref[...], 0.0)  # bias + ReLU (f32 on the VPU)
    # TODO(synk): dropout is identity in inference; training-mode dropout would
    # use pltpu.prng_seed + pltpu.prng_random_bits to build a keep mask here.

    # Second matmul (partial over F): h (TM, TF) . W2_tile (D, TF) -> (TM, D)
    acc_ref[...] += lax.dot_general(
        h.astype(w2_ref.dtype), w2_ref[...],
        dimension_numbers=(((1,), (1,)), ((), ())),
        preferred_element_type=jnp.float32,
    )

    @pl.when(f == pl.num_programs(1) - 1)
    def _():
        o_ref[...] = (acc_ref[...] + b2_ref[...]).astype(o_ref.dtype)


def feed_forward(x, w1, b1, w2, b2, *, tile_m=256, tile_f=1024):
    """x: (batch, seq, model_dim).
    w1: (d_ff, model_dim), b1: (d_ff,), w2: (model_dim, d_ff), b2: (model_dim,)
    -- PyTorch nn.Linear layout (out, in); no transposes are performed here."""
    batch, seq, model_dim = x.shape
    d_ff = w1.shape[0]
    M = batch * seq

    # ---- row (M) tiling: clamp for tiny problems, pad to a multiple of TM ----
    tm = min(tile_m, _round_up(M, 8))
    m_pad = (-M) % tm
    x2d = x.reshape(M, model_dim)
    if m_pad:
        x2d = jnp.pad(x2d, ((0, m_pad), (0, 0)))
    m_total = M + m_pad

    # ---- d_ff (F) tiling: stream weights; pad F to a multiple of TF ---------
    tf = min(tile_f, d_ff)
    f_pad = (-d_ff) % tf
    if f_pad:
        # Zero-padded F rows/cols contribute exactly 0 to the output.
        w1 = jnp.pad(w1, ((0, f_pad), (0, 0)))
        b1 = jnp.pad(b1, ((0, f_pad),))
        w2 = jnp.pad(w2, ((0, 0), (0, f_pad)))
    f_total = d_ff + f_pad

    b1_2d = b1.reshape(1, f_total)
    b2_2d = b2.reshape(1, model_dim)

    grid = (m_total // tm, f_total // tf)

    # ---- explicit VMEM budget from the chosen tiles (double-buffered I/O) ----
    x_item = jnp.dtype(x.dtype).itemsize
    w_item = jnp.dtype(w1.dtype).itemsize
    est = 2 * (tm * model_dim * x_item          # x tile
               + tf * model_dim * w_item        # W1 tile
               + tf * w_item                    # b1 tile
               + model_dim * tf * w_item        # W2 tile
               + model_dim * w_item             # b2
               + tm * model_dim * x_item)       # out tile
    est += tm * model_dim * 4                   # f32 accumulator scratch
    est += tm * tf * 4                          # live h intermediate
    vmem_limit = int(min(max(int(est * 1.4) + (2 << 20), 8 << 20), 64 << 20))

    out = pl.pallas_call(
        ffn_kernel,
        out_shape=jax.ShapeDtypeStruct((m_total, model_dim), x.dtype),
        grid_spec=pltpu.PrefetchScalarGridSpec(
            num_scalar_prefetch=0,
            grid=grid,
            in_specs=[
                pl.BlockSpec((tm, model_dim), lambda i, f: (i, 0)),   # x tile
                pl.BlockSpec((tf, model_dim), lambda i, f: (f, 0)),   # W1 F-tile
                pl.BlockSpec((1, tf), lambda i, f: (0, f)),           # b1 F-tile
                pl.BlockSpec((model_dim, tf), lambda i, f: (0, f)),   # W2 F-tile
                pl.BlockSpec((1, model_dim), lambda i, f: (0, 0)),    # b2
            ],
            out_specs=pl.BlockSpec((tm, model_dim), lambda i, f: (i, 0)),
            scratch_shapes=[pltpu.VMEM((tm, model_dim), jnp.float32)],
        ),
        compiler_params=pltpu.CompilerParams(
            dimension_semantics=("parallel", "arbitrary"),
            vmem_limit_bytes=vmem_limit,
        ),
    )(x2d, w1, b1_2d, w2, b2_2d)

    if m_pad:
        out = out[:M]
    return out.reshape(batch, seq, model_dim)


def _reference(x, w1, b1, w2, b2):
    h = jnp.maximum(jnp.einsum("bsd,fd->bsf", x, w1) + b1, 0.0)
    return jnp.einsum("bsf,df->bsd", h, w2) + b2


if __name__ == "__main__":
    batch, seq, model_dim, d_ff = 2, 8, 32, 64

    key = jax.random.PRNGKey(0)
    kx, k1, kb1, k2, kb2 = jax.random.split(key, 5)

    # Deterministic parameter init (PyTorch-Linear-like uniform bounds).
    bound1 = 1.0 / (model_dim ** 0.5)
    bound2 = 1.0 / (d_ff ** 0.5)
    x = jax.random.normal(kx, (batch, seq, model_dim), dtype=jnp.float32)
    w1 = jax.random.uniform(k1, (d_ff, model_dim), minval=-bound1, maxval=bound1,
                            dtype=jnp.float32)
    b1 = jax.random.uniform(kb1, (d_ff,), minval=-bound1, maxval=bound1,
                            dtype=jnp.float32)
    w2 = jax.random.uniform(k2, (model_dim, d_ff), minval=-bound2, maxval=bound2,
                            dtype=jnp.float32)
    b2 = jax.random.uniform(kb2, (model_dim,), minval=-bound2, maxval=bound2,
                            dtype=jnp.float32)

    y = feed_forward(x, w1, b1, w2, b2)
    y = jax.block_until_ready(y)

    y_ref = _reference(x, w1, b1, w2, b2)
    assert y.shape == (batch, seq, model_dim)
    assert jnp.allclose(y, y_ref, atol=1e-4, rtol=1e-4), "mismatch vs reference"

    print("KERNEL_OK")
</pallas_src>

<mosaic_0001>
module attributes {stable_mosaic.version = 11 : i64} {
  func.func @ffn_kernel(%arg0: i32, %arg1: i32, %arg2: memref<16x32xf32, #tpu.memory_space<vmem>>, %arg3: memref<64x32xf32, #tpu.memory_space<vmem>>, %arg4: memref<1x64xf32, #tpu.memory_space<vmem>>, %arg5: memref<32x64xf32, #tpu.memory_space<vmem>>, %arg6: memref<1x32xf32, #tpu.memory_space<vmem>>, %arg7: memref<16x32xf32, #tpu.memory_space<vmem>>, %arg8: memref<16x32xf32, #tpu.memory_space<vmem>>) attributes {dimension_semantics = [#tpu.dimension_semantics<parallel>, #tpu.dimension_semantics<arbitrary>], iteration_bounds = array<i64: 1, 1>, scalar_prefetch = 0 : i64, scratch_operands = 1 : i64, tpu.core_type = #tpu.core_type<tc>, window_params = [{transform_indices = @transform_0, window_bounds = array<i64: 16, 32>}, {transform_indices = @transform_1, window_bounds = array<i64: 64, 32>}, {transform_indices = @transform_2, window_bounds = array<i64: 1, 64>}, {transform_indices = @transform_3, window_bounds = array<i64: 32, 64>}, {pipeline_mode = #tpu.pipeline_mode<synchronous>, transform_indices = @transform_4, window_bounds = array<i64: 1, 32>}, {transform_indices = @transform_5, window_bounds = array<i64: 16, 32>}]} {
    %c0_i32 = arith.constant 0 : i32
    %0 = arith.cmpi eq, %arg1, %c0_i32 : i32
    %1 = arith.extui %0 : i1 to i32
    %c0_i32_0 = arith.constant 0 : i32
    %2 = arith.cmpi ne, %1, %c0_i32_0 : i32
    scf.if %2 {
      %cst_16 = arith.constant 0.000000e+00 : f32
      %19 = vector.broadcast %cst_16 : f32 to vector<16x32xf32>
      %c0_17 = arith.constant 0 : index
      %c0_18 = arith.constant 0 : index
      %20 = vector.load %arg8[%c0_17, %c0_18] : memref<16x32xf32, #tpu.memory_space<vmem>>, vector<16x32xf32>
      tpu.vector_store %arg8[%c0_17, %c0_18], %19 {strides = array<i32>} : memref<16x32xf32, #tpu.memory_space<vmem>>, vector<16x32xf32>,
    } else {
    }
    %c0 = arith.constant 0 : index
    %c0_1 = arith.constant 0 : index
    %3 = vector.load %arg2[%c0, %c0_1] : memref<16x32xf32, #tpu.memory_space<vmem>>, vector<16x32xf32>
    %c0_2 = arith.constant 0 : index
    %c0_3 = arith.constant 0 : index
    %4 = vector.load %arg3[%c0_2, %c0_3] : memref<64x32xf32, #tpu.memory_space<vmem>>, vector<64x32xf32>
    %cst = arith.constant dense<0.000000e+00> : vector<16x64xf32>
    %5 = tpu.matmul %3, %4, %cst {dimension_numbers = #tpu.dot_dimension_numbers<[1], [1], [0], [0], [0, 0, 1, 0], [], []>} : vector<16x32xf32>, vector<64x32xf32>, vector<16x64xf32> -> vector<16x64xf32>
    %c0_4 = arith.constant 0 : index
    %c0_5 = arith.constant 0 : index
    %6 = vector.load %arg4[%c0_4, %c0_5] : memref<1x64xf32, #tpu.memory_space<vmem>>, vector<1x64xf32>
    %7 = vector.broadcast %6 : vector<1x64xf32> to vector<16x64xf32>
    %8 = arith.addf %5, %7 : vector<16x64xf32>
    %cst_6 = arith.constant 0.000000e+00 : f32
    %9 = vector.broadcast %cst_6 : f32 to vector<16x64xf32>
    %10 = arith.maximumf %8, %9 : vector<16x64xf32>
    %c0_7 = arith.constant 0 : index
    %c0_8 = arith.constant 0 : index
    %11 = vector.load %arg8[%c0_7, %c0_8] : memref<16x32xf32, #tpu.memory_space<vmem>>, vector<16x32xf32>
    %c0_9 = arith.constant 0 : index
    %c0_10 = arith.constant 0 : index
    %12 = vector.load %arg5[%c0_9, %c0_10] : memref<32x64xf32, #tpu.memory_space<vmem>>, vector<32x64xf32>
    %cst_11 = arith.constant dense<0.000000e+00> : vector<16x32xf32>
    %13 = tpu.matmul %10, %12, %cst_11 {dimension_numbers = #tpu.dot_dimension_numbers<[1], [1], [0], [0], [0, 0, 1, 0], [], []>} : vector<16x64xf32>, vector<32x64xf32>, vector<16x32xf32> -> vector<16x32xf32>
    %14 = arith.addf %11, %13 : vector<16x32xf32>
    %c0_12 = arith.constant 0 : index
    %c0_13 = arith.constant 0 : index
    %15 = vector.load %arg8[%c0_12, %c0_13] : memref<16x32xf32, #tpu.memory_space<vmem>>, vector<16x32xf32>
    tpu.vector_store %arg8[%c0_12, %c0_13], %14 {strides = array<i32>} : memref<16x32xf32, #tpu.memory_space<vmem>>, vector<16x32xf32>,
    %c0_i32_14 = arith.constant 0 : i32
    %16 = arith.cmpi eq, %arg1, %c0_i32_14 : i32
    %17 = arith.extui %16 : i1 to i32
    %c0_i32_15 = arith.constant 0 : i32
    %18 = arith.cmpi ne, %17, %c0_i32_15 : i32
    scf.if %18 {
      %c0_16 = arith.constant 0 : index
      %c0_17 = arith.constant 0 : index
      %19 = vector.load %arg8[%c0_16, %c0_17] : memref<16x32xf32, #tpu.memory_space<vmem>>, vector<16x32xf32>
      %c0_18 = arith.constant 0 : index
      %c0_19 = arith.constant 0 : index
      %20 = vector.load %arg6[%c0_18, %c0_19] : memref<1x32xf32, #tpu.memory_space<vmem>>, vector<1x32xf32>
      %21 = vector.broadcast %20 : vector<1x32xf32> to vector<16x32xf32>
      %22 = arith.addf %19, %21 : vector<16x32xf32>
      %c0_20 = arith.constant 0 : index
      %c0_21 = arith.constant 0 : index
      %23 = vector.load %arg7[%c0_20, %c0_21] : memref<16x32xf32, #tpu.memory_space<vmem>>, vector<16x32xf32>
      tpu.vector_store %arg7[%c0_20, %c0_21], %22 {strides = array<i32>} : memref<16x32xf32, #tpu.memory_space<vmem>>, vector<16x32xf32>,
    } else {
    }
    return
  }
  func.func @transform_0(%arg0: i32, %arg1: i32) -> (i32, i32) {
    %c0_i32 = arith.constant 0 : i32
    %c0_i32_0 = arith.constant 0 : i32
    return %arg0, %c0_i32 : i32, i32
  }
  func.func @transform_1(%arg0: i32, %arg1: i32) -> (i32, i32) {
    %c0_i32 = arith.constant 0 : i32
    %c0_i32_0 = arith.constant 0 : i32
    return %arg1, %c0_i32 : i32, i32
  }
  func.func @transform_2(%arg0: i32, %arg1: i32) -> (i32, i32) {
    %c0_i32 = arith.constant 0 : i32
    %c0_i32_0 = arith.constant 0 : i32
    return %c0_i32, %arg1 : i32, i32
  }
  func.func @transform_3(%arg0: i32, %arg1: i32) -> (i32, i32) {
    %c0_i32 = arith.constant 0 : i32
    %c0_i32_0 = arith.constant 0 : i32
    return %c0_i32, %arg1 : i32, i32
  }
  func.func @transform_4(%arg0: i32, %arg1: i32) -> (i32, i32) {
    %c0_i32 = arith.constant 0 : i32
    %c0_i32_0 = arith.constant 0 : i32
    %c0_i32_1 = arith.constant 0 : i32
    return %c0_i32, %c0_i32_0 : i32, i32
  }
  func.func @transform_5(%arg0: i32, %arg1: i32) -> (i32, i32) {
    %c0_i32 = arith.constant 0 : i32
    %c0_i32_0 = arith.constant 0 : i32
    return %arg0, %c0_i32 : i32, i32
  }
}

</mosaic_0001>

<bundles_post_ra>
// kernel: tpu_custom_call.1
= control target key start
LH: loop header
LB: loop body
LE: loop exit
PB: predicated region body
PF: predicated region fallthrough
CT: control target
= control target key end

     0   :  { %vm25_vm0 = vcmask 261120   ;;  %vm159_vm1 = vcmask 523264   ;;  %s498_s0 = inlined_call_operand.vmem [shape: f32[16,32], index: 0, kind: input, shape index: {}]   ;;  %s499_s1 = inlined_call_operand.vmem [shape: f32[64,32], index: 1, kind: input, shape index: {}]   ;;  %s500_s2 = inlined_call_operand.vmem [shape: f32[1,64], index: 2, kind: input, shape index: {}]   ;;  %s501_s3 = inlined_call_operand.vmem [shape: f32[32,64], index: 3, kind: input, shape index: {}]   ;;  %s502_s4 = inlined_call_operand.vmem [shape: f32[1,32], index: 4, kind: input, shape index: {}]   ;;  %s503_s5 = inlined_call_operand.hbm [shape: f32[16,32], index: 5, kind: output, shape index: {}]  }
   0x1   :  { %v37_v0 = vld [vmem:[%s499_s1 + $0x38] sm:$0xff]  ;;  %v36_v1 = vld [vmem:[%s499_s1 + $0x30] sm:$0xff]  ;;  %v28_v2 = vld [vmem:[%s498_s0] sm:$0xff] }
   0x2   :  { %323 = vmatprep.subr.msk.mxu0 %vm25_vm0, %v37_v0  ;;  %339 = vmatprep.mubr.msk.f32.mxu0 %vm25_vm0, %v28_v2  ;;  %v158_v3 = vld [vmem:[%s501_s3 + $0x18] sm:$0xff]  ;;  %v157_v4 = vld [vmem:[%s501_s3 + $0x10] sm:$0xff]  ;;  %v35_v5 = vld [vmem:[%s499_s1 + $0x28] sm:$0xff] }
   0x3   :  { %324 = vmatpush3.xpose.msk.msra.mxu0 %vm25_vm0, %v37_v0  ;;  %342 = vmatprep.subr.msk.mxu1 %vm159_vm1, %v158_v3 }
   0x4   :  { %325 = vmatprep.subr.msk.mxu0 %vm25_vm0, %v36_v1 }
   0x5   :  { %10 = vsyncpa [#allocation4], 0  ;;  %343 = vmatpush3.xpose.msk.msra.mxu1 %vm159_vm1, %v158_v3  ;;  %v34_v6 = vld [vmem:[%s499_s1 + $0x20] sm:$0xff]  ;;  %v33_v7 = vld [vmem:[%s499_s1 + $0x18] sm:$0xff]  ;;  %v379_v14 = vmov 0.0   ;;  %s380_s21 = smov [#allocation3]  }
   0x6   :  { %344 = vmatprep.subr.msk.mxu1 %vm159_vm1, %v157_v4  ;;  %v32_v8 = vld [vmem:[%s499_s1 + $0x10] sm:$0xff]  ;;  %v31_v9 = vld [vmem:[%s499_s1 + $0x8] sm:$0xff]  ;;  %v30_v10 = vld [vmem:[%s499_s1] sm:$0xff]  ;;  %27 = vst.msk [vmem:[#allocation2 + $0x8] sm:$0xff] %vm25_vm0, %v379_v14  ;;  %s278_s22 = sshll.u32 %s380_s21, 4  ;;  %s279_s22 = int_to_ptr.vmem [resolvable:$true] %s278_s22 }
   0x7   :  { %326 = vmatpush3.xpose.msk.msra.mxu0 %vm25_vm0, %v36_v1  ;;  %v29_v11 = vld [vmem:[%s498_s0 + $0x8] sm:$0xff]  ;;  %v155_v13 = vld [vmem:[%s501_s3] sm:$0xff]  ;;  %26 = vst.msk [vmem:[#allocation2] sm:$0xff] %vm25_vm0, %v379_v14  ;;  %s357_s23 = scalar_lea.vmem %s279_s22, 256  ;;  %p362_p1 = scmp.lt.s32.totalorder %s279_s22, %s279_s22 }
   0x8   :  { %327 = vmatprep.subr.msk.mxu0 %vm25_vm0, %v35_v5  ;;  %v156_v12 = vld [vmem:[%s501_s3 + $0x8] sm:$0xff]  ;;  %v289_v15 = vld [vmem:[%s500_s2] ss:$0 sm:$0xff]  ;;  %p358_p0 = scmp.ne.s32.totalorder %s279_s22, %s357_s23  ;;  %p363_p2 = scmp.lt.s32.totalorder %s357_s23, %s357_s23 }
   0x9   :  { %345 = vmatpush3.xpose.msk.msra.mxu1 %vm159_vm1, %v157_v4  ;;  %v306_v28 = vld [vmem:[%s502_s4] ss:$0 sm:$0xff] }
   0xa   :  { %346 = vmatprep.subr.msk.mxu1 %vm159_vm1, %v156_v12  ;;  %p364_p3 = por %p363_p2, %p362_p1 }
   0xb   :  { %328 = vmatpush3.xpose.msk.msra.mxu0 %vm25_vm0, %v35_v5 }
   0xc   :  { %329 = vmatprep.subr.msk.mxu0 %vm25_vm0, %v34_v6  ;;  %p365_p4 = pnand %p364_p3, %p358_p0 }
   0xd   :  { %347 = vmatpush3.xpose.msk.msra.mxu1 %vm159_vm1, %v156_v12  ;;  %v154_v22 = vld [vmem:[#allocation2 + $0x8] sm:$0xff] }
   0xe   :  { %348 = vmatprep.subr.msk.mxu1 %vm159_vm1, %v155_v13  ;;  %v153_v24 = vld [vmem:[#allocation2] sm:$0xff] }
   0xf   :  { %330 = vmatpush3.xpose.msk.msra.mxu0 %vm25_vm0, %v34_v6 }
  0x10   :  { %331 = vmatprep.subr.msk.mxu0 %vm25_vm0, %v33_v7 }
  0x11   :  { %349 = vmatpush3.xpose.msk.msra.mxu1 %vm159_vm1, %v155_v13 }
  0x13   :  { %332 = vmatpush3.xpose.msk.msra.mxu0 %vm25_vm0, %v33_v7 }
  0x14   :  { %333 = vmatprep.subr.msk.mxu0 %vm25_vm0, %v32_v8 }
  0x17   :  { %334 = vmatpush3.xpose.msk.msra.mxu0 %vm25_vm0, %v32_v8 }
  0x18   :  { %335 = vmatprep.subr.msk.mxu0 %vm25_vm0, %v31_v9 }
  0x1b   :  { %336 = vmatpush3.xpose.msk.msra.mxu0 %vm25_vm0, %v31_v9 }
  0x1c   :  { %337 = vmatprep.subr.msk.mxu0 %vm25_vm0, %v30_v10 }
  0x1f   :  { %338 = vmatpush3.xpose.msk.msra.mxu0 %vm25_vm0, %v30_v10 }
  0x22   :  { %340 = vmatmul.mubr.msk.f32.vlgmr.msra.gmra.mxu0 %vm25_vm0, %v29_v11 }
  0xe2   :  { %v341_v16 = vpop.f32.mrf.mxu0 }
  0xe3   :  { %v148_v17 = vadd.f32 %v341_v16, %v289_v15 }
  0xe4   :  { %v142_v18 = vpop.f32.mrf.mxu0 }
  0xe5   :  { %v143_v19 = vadd.f32 %v289_v15, %v142_v18  ;;  %v152_v21 = vmax.f32 %v148_v17, 0.0 }
  0xe7   :  { %v151_v20 = vmax.f32 %v143_v19, 0.0 }
  0xe9   :  { %350 = vmatprep.mubr.msk.f32.mxu1 %vm159_vm1, %v151_v20 }
  0xea   :  { %351 = vmatmul.mubr.msk.f32.vlgmr.msra.gmra.mxu1 %vm159_vm1, %v152_v21 }
 0x1aa   :  { %v352_v23 = vpop.f32.mrf.mxu1 }
 0x1ab   :  { %v254_v25 = vadd.f32 %v352_v23, %v154_v22 }
 0x1ac   :  { %v244_v26 = vpop.f32.mrf.mxu1 }
 0x1ad   :  { %256 = vst.msk [vmem:[#allocation2 + $0x8] sm:$0xff] %vm25_vm0, %v254_v25  ;;  %v253_v27 = vadd.f32 %v244_v26, %v153_v24 }
 0x1af   :  { %255 = vst.msk [vmem:[#allocation2] sm:$0xff] %vm25_vm0, %v253_v27 }
 0x1b4   :  { %v261_v29 = vld [vmem:[#allocation2 + $0x8] sm:$0xff] }
 0x1b5   :  { %v270_v30 = vadd.f32 %v306_v28, %v261_v29 }
 0x1b6   :  { %v260_v31 = vld [vmem:[#allocation2] sm:$0xff] }
 0x1b7   :  { %v269_v32 = vadd.f32 %v306_v28, %v260_v31  ;;  %272 = vst.msk [vmem:[#allocation3 + $0x8] sm:$0xff] %vm25_vm0, %v270_v30 }
 0x1b9   :  { %271 = vst.msk [vmem:[#allocation3] sm:$0xff] %vm25_vm0, %v269_v32 }
 0x1ba   :  { %368 = shalt.err (!%p365_p4)
}
 0x1bb   :  { %s381_s24 = smov 128   ;;  %s382_s4 = smov 8  }
 0x1bc   :  { %284 = dma.vmem_to_hbm [thread:$0]  %s279_s22, 256, %s503_s5, [#allocation4], %s381_s24, %s381_s24, %s382_s4  }
 0x1bd   :  { %377 = dma.done.wait [#allocation4], 256  }
 0x1be   :  { %378 = vsyncadd [#allocation4], 4294967040 }
 0x1bf   :  { %288 = vsyncpa [#allocation4], 1 }

</bundles_post_ra>
